<compile_context>
chip_gen: v7x
topology: tpu7x:2x2x1
jax: 0.10.0
libtpu: 0.0.40
codegen_flags: <defaults>
</compile_context>

<pallas_src>
import jax
import jax.numpy as jnp
from jax.experimental import pallas as pl
from jax.experimental.pallas import tpu as pltpu

_LANES = 128
_TARGET_BLOCK_BYTES = 4 * 1024 * 1024  # ~4 MiB per block (in + out double-buffered = 16 MiB live)
_VMEM_LIMIT_BYTES = 32 * 1024 * 1024   # explicit scoped-VMEM budget (safe on v5e/v6e/v7x)


def _hard_sigmoid_math(x):
    three = jnp.asarray(3.0, x.dtype)
    zero = jnp.asarray(0.0, x.dtype)
    six = jnp.asarray(6.0, x.dtype)
    return jnp.clip(x + three, zero, six) / six


def _hard_sigmoid_kernel(x_ref, o_ref):
    o_ref[...] = _hard_sigmoid_math(x_ref[...]).astype(o_ref.dtype)


def _round_up(a: int, m: int) -> int:
    return ((a + m - 1) // m) * m


def hard_sigmoid(x: jax.Array, *, min_pallas_elems: int = 64 * 1024) -> jax.Array:
    """Elementwise hard-sigmoid, matching F.relu6(x + 3) / 6 (inplace-equivalent)."""
    orig_shape = x.shape
    total = x.size
    itemsize = jnp.dtype(x.dtype).itemsize

    # Small-tensor bypass: pallas_call launch + layout plumbing would dominate;
    # let XLA fuse this into surrounding ops (typical SE gate is (N, C, 1, 1)).
    if total < min_pallas_elems:
        return _hard_sigmoid_math(x).astype(x.dtype)

    # Ragged sizes: padding + output slicing would roughly double HBM traffic
    # for a bandwidth-bound op, so the fused XLA fallback is strictly faster.
    if total % _LANES != 0:
        return _hard_sigmoid_math(x).astype(x.dtype)

    # Flatten to a lane-dense 2D slab (rows, 128) — no padding needed here.
    rows = total // _LANES
    x2d = jnp.ravel(x).reshape(rows, _LANES)

    # Dtype-aware row tile (~4 MiB block), rounded to the sublane-packing
    # multiple: 8 for 4-byte, 16 for 2-byte, 32 for 1-byte dtypes.
    sub_mult = max(8, 32 // itemsize)
    tr_max = max(sub_mult,
                 (_TARGET_BLOCK_BYTES // (_LANES * itemsize)) // sub_mult * sub_mult)

    if rows <= sub_mult:
        # Tiny slab (only reachable when the bypass is disabled): one full block.
        tr = rows
    else:
        # Prefer an even number of grid steps (>= 2) so v7x's two TensorCores
        # both stream and there is no odd-step tail imbalance.
        n_steps = max(2, pl.cdiv(rows, tr_max))
        if n_steps % 2:
            n_steps += 1
        tr = _round_up(pl.cdiv(rows, n_steps), sub_mult)
    grid = pl.cdiv(rows, tr)

    cost = pl.CostEstimate(
        flops=3 * total,            # add + clamp + div per element
        transcendentals=0,
        bytes_accessed=2 * total * itemsize,  # read + write, memory-bound
    )

    out2d = pl.pallas_call(
        _hard_sigmoid_kernel,
        out_shape=jax.ShapeDtypeStruct((rows, _LANES), x.dtype),
        grid_spec=pltpu.PrefetchScalarGridSpec(
            num_scalar_prefetch=0,
            grid=(grid,),
            in_specs=[pl.BlockSpec((tr, _LANES), lambda i: (i, 0))],
            out_specs=pl.BlockSpec((tr, _LANES), lambda i: (i, 0)),
        ),
        compiler_params=pltpu.CompilerParams(
            dimension_semantics=("parallel",),
            allow_input_fusion=[True],
            vmem_limit_bytes=_VMEM_LIMIT_BYTES,
        ),
        cost_estimate=cost,
    )(x2d)

    return out2d.reshape(orig_shape)


if __name__ == "__main__":
    key = jax.random.PRNGKey(0)

    # 1) Small NCHW input consistent with TResNet usage (bypass -> fused XLA).
    x = jax.random.normal(key, (2, 4, 16, 16), dtype=jnp.float32) * 4.0
    y_ref = jnp.clip(x + 3.0, 0.0, 6.0) / 6.0
    y_bypass = jax.block_until_ready(hard_sigmoid(x))
    assert y_bypass.shape == x.shape and y_bypass.dtype == x.dtype
    assert jnp.allclose(y_bypass, y_ref, atol=1e-6, rtol=1e-6)

    # 2) Force the Pallas kernel on the same small input (2 grid steps, 8x128 blocks).
    y_pallas = jax.block_until_ready(hard_sigmoid(x, min_pallas_elems=0))
    assert y_pallas.shape == x.shape and y_pallas.dtype == x.dtype
    assert jnp.allclose(y_pallas, y_ref, atol=1e-6, rtol=1e-6)

    # 3) Larger f32 activation: rows=4704 -> even 2-step grid with balanced 2352-row tiles.
    x_big = jax.random.normal(jax.random.PRNGKey(1), (3, 64, 56, 56),
                              dtype=jnp.float32) * 4.0
    y_big = jax.block_until_ready(hard_sigmoid(x_big))
    y_big_ref = jnp.clip(x_big + 3.0, 0.0, 6.0) / 6.0
    assert y_big.shape == x_big.shape and y_big.dtype == x_big.dtype
    assert jnp.allclose(y_big, y_big_ref, atol=1e-6, rtol=1e-6)

    # 4) bf16 activation exercising the dtype-scaled tile (sublane multiple 16).
    x_bf16 = (jax.random.normal(jax.random.PRNGKey(2), (2, 64, 32, 32),
                                dtype=jnp.float32) * 4.0).astype(jnp.bfloat16)
    y_bf16 = jax.block_until_ready(hard_sigmoid(x_bf16))
    y_bf16_ref = _hard_sigmoid_math(x_bf16)
    assert y_bf16.shape == x_bf16.shape and y_bf16.dtype == jnp.bfloat16
    assert jnp.allclose(y_bf16.astype(jnp.float32), y_bf16_ref.astype(jnp.float32),
                        atol=1e-2, rtol=1e-2)

    # 5) Ragged total (not a multiple of 128) -> XLA fallback, no pad/slice traffic.
    x_rag = jax.random.normal(jax.random.PRNGKey(3), (3, 5, 7, 11),
                              dtype=jnp.float32) * 4.0
    y_rag = jax.block_until_ready(hard_sigmoid(x_rag, min_pallas_elems=0))
    y_rag_ref = jnp.clip(x_rag + 3.0, 0.0, 6.0) / 6.0
    assert y_rag.shape == x_rag.shape and y_rag.dtype == x_rag.dtype
    assert jnp.allclose(y_rag, y_rag_ref, atol=1e-6, rtol=1e-6)

    print("KERNEL_OK")
</pallas_src>

<mosaic_0001>
module attributes {stable_mosaic.version = 11 : i64} {
  func.func @_hard_sigmoid_kernel(%arg0: i32, %arg1: memref<8x128xf32, #tpu.memory_space<vmem>>, %arg2: memref<8x128xf32, #tpu.memory_space<vmem>>) attributes {dimension_semantics = [#tpu.dimension_semantics<parallel>], iteration_bounds = array<i64: 2>, scalar_prefetch = 0 : i64, scratch_operands = 0 : i64, tpu.core_type = #tpu.core_type<tc>, window_params = [{transform_indices = @transform_0, window_bounds = array<i64: 8, 128>}, {transform_indices = @transform_1, window_bounds = array<i64: 8, 128>}]} {
    %c0 = arith.constant 0 : index
    %c0_0 = arith.constant 0 : index
    %0 = vector.load %arg1[%c0, %c0_0] : memref<8x128xf32, #tpu.memory_space<vmem>>, vector<8x128xf32>
    %cst = arith.constant 3.000000e+00 : f32
    %1 = vector.broadcast %cst : f32 to vector<8x128xf32>
    %2 = arith.addf %0, %1 : vector<8x128xf32>
    %cst_1 = arith.constant 0.000000e+00 : f32
    %cst_2 = arith.constant 6.000000e+00 : f32
    %3 = vector.broadcast %cst_1 : f32 to vector<8x128xf32>
    %4 = arith.maximumf %3, %2 : vector<8x128xf32>
    %5 = vector.broadcast %cst_2 : f32 to vector<8x128xf32>
    %6 = arith.minimumf %5, %4 : vector<8x128xf32>
    %cst_3 = arith.constant 6.000000e+00 : f32
    %7 = vector.broadcast %cst_3 : f32 to vector<8x128xf32>
    %8 = arith.divf %6, %7 : vector<8x128xf32>
    %c0_4 = arith.constant 0 : index
    %c0_5 = arith.constant 0 : index
    %9 = vector.load %arg2[%c0_4, %c0_5] : memref<8x128xf32, #tpu.memory_space<vmem>>, vector<8x128xf32>
    tpu.vector_store %arg2[%c0_4, %c0_5], %8 {strides = array<i32>} : memref<8x128xf32, #tpu.memory_space<vmem>>, vector<8x128xf32>,
    return
  }
  func.func @transform_0(%arg0: i32) -> (i32, i32) {
    %c0_i32 = arith.constant 0 : i32
    %c0_i32_0 = arith.constant 0 : i32
    return %arg0, %c0_i32 : i32, i32
  }
  func.func @transform_1(%arg0: i32) -> (i32, i32) {
    %c0_i32 = arith.constant 0 : i32
    %c0_i32_0 = arith.constant 0 : i32
    return %arg0, %c0_i32 : i32, i32
  }
}

</mosaic_0001>

<bundles_post_ra>
// kernel: tpu_custom_call.1
= control target key start
LH: loop header
LB: loop body
LE: loop exit
PB: predicated region body
PF: predicated region fallthrough
CT: control target
= control target key end

     0   :  { %6 = vsyncpa [#allocation3], 0  ;;  %s552_s0 = inlined_call_operand.hbm [shape: f32[16,128], index: 0, kind: input, shape index: {}]   ;;  %s553_s1 = inlined_call_operand.hbm [shape: f32[16,128], index: 1, kind: output, shape index: {}]  }
   0x1   :  { %8 = vsyncpa [#allocation3 + $0x1], 0 }
   0x2   :  { %9 = vsyncpa [#allocation4], 0 }
   0x3   :  { %11 = vsyncpa [#allocation4 + $0x1], 0  ;;  %s391_s6 = smov 0   ;;  %s393_s7 = smov 0  }
   0x4   :  { %s395_s8 = smov 0   ;;  %s397_s9 = smov 0  }
   0x5 LB: > { %s412_s10 = sadd.s32 4294967295, %s377_s9   ;;  %s223_s11 = sadd.s32 4294967294, %s377_s9   ;;  %s377_s9 = sphi %s397_s9, %s568_s9   ;;  %s373_s8 = sphi %s395_s8, %s567_s8   ;;  %s369_s7 = sphi %s393_s7, %s566_s7   ;;  %s365_s6 = sphi %s391_s6, %s565_s6  }
   0x6   : > { %s416_s12 = sadd.s32 1, %s377_s9   ;;  %s24_s13 = sadd.s32 1, %s373_s8 }
   0x7   : > { %s21_s14 = ssub.s32 %s377_s9, %s416_s12  ;;  %p31_p0 = scmp.ne.s32.totalorder %s373_s8, %s369_s7 }
   0x8   : > { %p22_p1 = scmp.eq.s32.totalorder %s21_s14, 0  ;;  %p32_p2 = scmp.eq.s32.totalorder %s377_s9, 0 }
   0x9   : > { %p37_p3 = scmp.ne.s32.totalorder %s369_s7, %s365_s6  ;;  %p38_p4 = scmp.eq.s32.totalorder %s412_s10, 0 }
   0xa   : > { %s428_s15 = scalar_select %p22_p1, %s373_s8, %s24_s13  }
   0xb   : > { %p430_p5 = por %p32_p2, %p31_p0  ;;  %p434_p6 = por %p38_p4, %p37_p3 }
   0xc   : > { %p61_p7 = scmp.eq.s32.totalorder %s412_s10, 1  ;;  %p67_p8 = scmp.eq.s32.totalorder %s223_s11, 1 }
   0xd   : > { %p247_p10 = scmp.lt.s32.totalorder %s377_s9, 2  ;;  %s87_s20 = sand.u32 1, %s373_s8  }
   0xe   : > { %p441_p11 = por %p61_p7, %p31_p0  ;;  %p445_p12 = por %p67_p8, %p37_p3 }
   0xf   : > { %s227_s21 = sshll.u32 %s377_s9, 7  ;;  %s226_s22 = sshll.u32 %s87_s20, 3 }
  0x10   : > { %s557_s18 = scalar_select %p441_p11, 1, 0 }
  0x11   : > { %s558_s19 = scalar_select %p445_p12, 1, 0 }
  0x12   : > { %s454_s25 = scalar_lea.hbm %s552_s0, %s227_s21  ;;  %s91_s26 = scalar_lea.vmem [#allocation2], %s226_s22 }
  0x13   : > { %s98_s27 = sshll.u32 %s91_s26, 4  ;;  %p458_p13 = pnand %p247_p10, %p430_p5  ;;  %s462_s27 = int_to_ptr.vmem [resolvable:$true] %s98_s27 }
  0x14   : > { %s88_s29 = scalar_lea.sflag [#allocation3], %s87_s20  ;;  %s281_s30 = scalar_lea.hbm %s454_s25, 128 }
  0x15   : > { %p282_p2 = scmp.ne.s32.totalorder %s454_s25, %s281_s30  ;;  %p283_p3 = pneg %p458_p13 }
  0x16   : > { %s286_s4 = scalar_lea.hbm %s552_s0, 256  ;;  %p287_p5 = scmp.lt.u32.totalorder %s454_s25, %s552_s0 }
  0x17   : > { %p284_p4 = pnand %p283_p3, %p282_p2  ;;  %p288_p8 = scmp.lt.u32.totalorder %s286_s4, %s281_s30 }
  0x18   : > { %p290_p9 = scmp.lt.u32.totalorder %s281_s30, %s454_s25 }
  0x19   : > { %p285_p7 = pneg %p284_p4  ;;  %p289_p10 = por %p288_p8, %p287_p5 }
  0x1b   : > { %p291_p0 = por %p290_p9, %p289_p10 }
  0x1d   : > { %p292_p1 = pnand %p291_p0, %p285_p7 }
  0x1f   : > { %295 = shalt.err (!%p292_p1)
}
  0x20   : > { %s296_s13 = scalar_lea.vmem %s462_s27, 128  ;;  %s379_s14 = smov [#allocation2]  }
  0x21   : > { %p297_p2 = scmp.ne.s32.totalorder %s462_s27, %s296_s13  ;;  %s301_s16 = sshll.u32 %s379_s14, 4  ;;  %s302_s16 = int_to_ptr.vmem [resolvable:$false] %s301_s16 }
  0x22   : > { %s303_s20 = scalar_lea.vmem %s302_s16, 256  ;;  %p304_p11 = scmp.lt.s32.totalorder %s462_s27, %s302_s16 }
  0x23   : > { %p299_p4 = pnand %p297_p2, %p283_p3  ;;  %p305_p5 = scmp.lt.s32.totalorder %s303_s20, %s296_s13 }
  0x25   : > { %p300_p12 = pneg %p299_p4  ;;  %p306_p8 = por %p305_p5, %p304_p11 }
  0x27   : > { %p307_p9 = pnand %p306_p8, %p300_p12 }
  0x29   : > { %310 = shalt.err (!%p307_p9)
}
  0x2a   : > { %242 = dma.hbm_to_vmem [thread:$0]  (!%p458_p13), %s454_s25, 128, %s462_s27, %s88_s29  }
  0x2b   : > { %p560_p0 = scmp.lt.s32.totalorder %s377_s9, 3  ;;  %p561_p1 = scmp.ge.s32.totalorder %s377_s9, 1 }
  0x2d   : > { %p104_p3 = pnand %p561_p1, %p560_p0 }
  0x2e   : > { %s496_s21 = sand.u32 (!%p104_p3), 1, %s369_s7  }
  0x2f   : > { %107 = sbr.rel (%p104_p3) target bundleno = 81 (0x51), region = 24  ;;  %s229_s22 = sshll.u32 (!%p104_p3), %s496_s21, 3 }
  0x30   : > { %s110_s23 = scalar_lea.sflag (!%p104_p3), [#allocation3], %s496_s21  ;;  %s113_s24 = scalar_lea.vmem (!%p104_p3), [#allocation2], %s229_s22 }
  0x36   : > { %356 = dma.done.wait (%p434_p6), %s110_s23, 128  }
  0x37   : > { %358 = vsyncadd (%p434_p6), %s110_s23, 4294967168  ;;  %v132_v0 = vld [vmem:[%s113_s24] sm:$0xff]  ;;  %s131_s25 = scalar_lea.vmem [#allocation5], %s229_s22  ;;  %s232_s27 = sshll.u32 %s412_s10, 7 }
  0x38   : > { %v133_v1 = vadd.f32 3.0, %v132_v0  ;;  %s153_s26 = sshll.u32 %s131_s25, 4  ;;  %s510_s17 = scalar_lea.hbm %s553_s1, %s232_s27  ;;  %s505_s26 = int_to_ptr.vmem [resolvable:$true] %s153_s26 }
  0x39   : > { %s140_s30 = scalar_lea.sflag [#allocation4], %s496_s21  ;;  %s311_s2 = scalar_lea.vmem %s505_s26, 128 }
  0x3a   : > { %v134_v2 = vmax.f32 %v133_v1, 0.0  ;;  %p312_p6 = scmp.ne.s32.totalorder %s505_s26, %s311_s2  ;;  %p562_p11 = scmp.ne.s32.totalorder %s557_s18, 0 }
  0x3b   : > { %s380_s10 = smov [#allocation5]  }
  0x3c   : > { %v135_v3 = vmin.f32 %v134_v2, 6.0  ;;  %p313_p12 = pnand %p312_p6, %p562_p11  ;;  %s315_s3 = sshll.u32 %s380_s10, 4  ;;  %s316_s3 = int_to_ptr.vmem [resolvable:$false] %s315_s3 }
  0x3d   : > { %s317_s4 = scalar_lea.vmem %s316_s3, 256  ;;  %p318_p7 = scmp.lt.s32.totalorder %s505_s26, %s316_s3 }
  0x3e   : > { %v137_v4 = vmul.f32 0.16666667, %v135_v3  ;;  %p314_p13 = pneg %p313_p12  ;;  %p319_p10 = scmp.lt.s32.totalorder %s317_s4, %s311_s2 }
  0x40   : > { %138 = vst [vmem:[%s131_s25] sm:$0xff] %v137_v4  ;;  %p320_p2 = por %p319_p10, %p318_p7 }
  0x42   : > { %p321_p4 = pnand %p320_p2, %p314_p13 }
  0x44   : > { %324 = shalt.err (!%p321_p4)
}
  0x45   : > { %s325_s5 = scalar_lea.hbm %s510_s17, 128  ;;  %s329_s14 = scalar_lea.hbm %s553_s1, 256 }
  0x46   : > { %p326_p5 = scmp.ne.s32.totalorder %s510_s17, %s325_s5  ;;  %p330_p0 = scmp.lt.u32.totalorder %s510_s17, %s553_s1 }
  0x47   : > { %p331_p1 = scmp.lt.u32.totalorder %s329_s14, %s325_s5  ;;  %p333_p6 = scmp.lt.u32.totalorder %s325_s5, %s510_s17 }
  0x48   : > { %p327_p8 = pnand %p326_p5, %p562_p11 }
  0x49   : > { %p332_p3 = por %p331_p1, %p330_p0 }
  0x4a   : > { %p328_p9 = pneg %p327_p8 }
  0x4b   : > { %p334_p12 = por %p333_p6, %p332_p3 }
  0x4d   : > { %p335_p13 = pnand %p334_p12, %p328_p9 }
  0x4f   : > { %338 = shalt.err (!%p335_p13)
}
  0x50   : > { %237 = dma.vmem_to_hbm [thread:$0]  (%p562_p11), %s505_s26, 128, %s510_s17, %s140_s30  }
  0x51 PF: > { %s165_s21 = sand.u32 1, %s365_s6   ;;  %p563_p7 = scmp.ne.s32.totalorder %s558_s19, 0 }
  0x52   : > { %p564_p10 = scmp.ge.s32.totalorder %s377_s9, 2  ;;  %s166_s22 = scalar_lea.sflag [#allocation4], %s165_s21 }
  0x54   : > { %p244_p2 = pnand %p564_p10, %p563_p7 }
  0x56   : > { %360 = dma.done.wait (!%p244_p2), %s166_s22, 128  }
  0x57   : > { %362 = vsyncadd (!%p244_p2), %s166_s22, 4294967168  ;;  %p14_p4 = scmp.ge.s32.totalorder %s416_s12, 4   ;;  %s565_s6 = smov %s369_s7 }
  0x58   : > { %s566_s7 = smov %s373_s8  ;;  %s567_s8 = smov %s428_s15 }
  0x59   : > { %s568_s9 = smov %s416_s12  ;;  %16 = sbr.rel (!%p14_p4) target bundleno = 5 (0x5), region = 69 }
  0x60   :  { %171 = vsyncpa [#allocation3], 1 }
  0x61   :  { %173 = vsyncpa [#allocation3 + $0x1], 1 }
  0x62   :  { %174 = vsyncpa [#allocation4], 1 }
  0x63   :  { %176 = vsyncpa [#allocation4 + $0x1], 1 }

</bundles_post_ra>
